<compile_context>
chip_gen: v7x
topology: tpu7x:2x2x1
jax: 0.10.0
libtpu: 0.0.40
codegen_flags: <defaults>
</compile_context>

<pallas_src>
import jax
import jax.numpy as jnp
from jax.experimental import pallas as pl
from jax.experimental.pallas import tpu as pltpu

IN_F = 24
HID_F = 20
OUT_F = 4
DEFAULT_TILE_N = 8192  # rows (lanes) per grid step; multiple of 128


def _round_up(a, b):
    return (a + b - 1) // b * b


def fc_loc_kernel(x_ref, w1_ref, b1_ref, w2_ref, b2_ref, o_ref):
    """Feature-major fc_loc: batch rows live on the 128-lane axis.

    x_ref : (24, tile)   w1_ref: (20, 24)   b1_ref: (20, 1)
    w2_ref: (4, 20)      b2_ref: (4, 1)     o_ref : (4, tile)
    """
    x = x_ref[...]
    if x.dtype != jnp.float32:
        x = x.astype(jnp.float32)  # optional bf16 x-stream, accumulate in f32
    h = jnp.dot(w1_ref[...], x, preferred_element_type=jnp.float32) + b1_ref[...]
    h = jnp.maximum(h, 0.0)  # ReLU(inplace=True) is a plain ReLU here
    o = jnp.dot(w2_ref[...], h, preferred_element_type=jnp.float32) + b2_ref[...]
    o_ref[...] = o.astype(o_ref.dtype)


def spatial_transform_forward(x, w1, b1, w2, b2, *, tile_n=DEFAULT_TILE_N,
                              x_dtype=jnp.float32):
    """Equivalent of spatial_transform.forward(x).

    x : any float array whose total size is a multiple of 24.
    w1: (20, 24), b1: (20,), w2: (4, 20), b2: (4,)  (PyTorch Linear layout).
    Returns (N, 4) float32 where N = x.size // 24.
    """
    assert tile_n % 128 == 0, "tile_n must be a multiple of 128 (lane constraint)"
    n = x.size // IN_F

    # One-time layout change in the wrapper: (N, 24) row-major -> (24, N)
    # feature-major so the batch dimension sits on the 128-lane axis inside the
    # kernel (lane-dense loads/stores, full-width VPU/MXU work).
    xt = jnp.asarray(x).reshape(n, IN_F).astype(x_dtype).T  # (24, N)
    w1 = jnp.asarray(w1, jnp.float32).reshape(HID_F, IN_F)
    b1 = jnp.asarray(b1, jnp.float32).reshape(HID_F, 1)
    w2 = jnp.asarray(w2, jnp.float32).reshape(OUT_F, HID_F)
    b2 = jnp.asarray(b2, jnp.float32).reshape(OUT_F, 1)

    # Tile selection: large tiles amortize the ~0.35 us per-step overhead; in
    # the feature-major layout an 8192-row tile is <1 MiB per double-buffered
    # stream, fine on every generation.  For large N cap the tile so the grid
    # keeps >= 8 steps (v7x megacore sharding) without dropping below 1024 rows.
    tile = min(tile_n, _round_up(n, 128))
    if n >= 8 * 1024:
        tile = min(tile, max(1024, _round_up(-(-n // 8), 128)))

    grid = (pl.cdiv(n, tile),)  # ragged trailing block is masked by Pallas
    out_t = pl.pallas_call(
        fc_loc_kernel,
        out_shape=jax.ShapeDtypeStruct((OUT_F, n), jnp.float32),
        grid_spec=pltpu.PrefetchScalarGridSpec(
            num_scalar_prefetch=0,
            grid=grid,
            in_specs=[
                # Streamed, double-buffered (24, tile) column-slabs of x.
                pl.BlockSpec((IN_F, tile), lambda i: (0, i)),
                # Weights/biases: full arrays, constant block index -> fetched
                # once and VMEM-resident across all grid steps (<3 KiB total).
                pl.BlockSpec((HID_F, IN_F), lambda i: (0, 0)),
                pl.BlockSpec((HID_F, 1), lambda i: (0, 0)),
                pl.BlockSpec((OUT_F, HID_F), lambda i: (0, 0)),
                pl.BlockSpec((OUT_F, 1), lambda i: (0, 0)),
            ],
            out_specs=pl.BlockSpec((OUT_F, tile), lambda i: (0, i)),
        ),
        compiler_params=pltpu.CompilerParams(
            # Row slabs are independent -> shard across both TCs on v7x.
            dimension_semantics=("parallel",),
        ),
    )(xt, w1, b1, w2, b2)

    # Back to the (N, 4) shape the PyTorch module returns.
    return out_t.T


def init_params(key):
    """Parameter init mirroring the PyTorch module's __init__ (PyTorch layout).

    Linear(24, 20): default init  U(-1/sqrt(24), 1/sqrt(24)).
    Linear(20, 4):  weight zeroed, bias = [1, 0, 1, 0].
    """
    k_w1, k_b1 = jax.random.split(key)
    bound = 1.0 / jnp.sqrt(24.0)
    w1 = jax.random.uniform(k_w1, (HID_F, IN_F), jnp.float32, -bound, bound)
    b1 = jax.random.uniform(k_b1, (HID_F,), jnp.float32, -bound, bound)
    w2 = jnp.zeros((OUT_F, HID_F), jnp.float32)          # .weight.data.zero_()
    b2 = jnp.array([1.0, 0.0, 1.0, 0.0], jnp.float32)    # .bias.data.copy_(...)
    return w1, b1, w2, b2


if __name__ == "__main__":
    key = jax.random.PRNGKey(0)
    k_params, k_w2, k_x1, k_x2 = jax.random.split(key, 4)

    w1, b1, w2, b2 = init_params(k_params)
    # The module zeroes the second Linear's weight (output == bias for any
    # input); also test with a non-zero w2 so layer 1 is actually validated.
    w2_rand = 0.1 * jax.random.normal(k_w2, (OUT_F, HID_F), dtype=jnp.float32)

    def reference(x, w2_):
        x2 = x.reshape(-1, IN_F).astype(jnp.float32)
        h = jnp.maximum(x2 @ w1.T + b1, 0.0)
        return h @ w2_.T + b2

    # (2, 5, 12, 12) -> N = 60 rows: single, partially-masked 128-lane block.
    x_a = jax.random.normal(k_x1, (2, 5, 12, 12), dtype=jnp.float32)
    out_a = jax.block_until_ready(
        spatial_transform_forward(x_a, w1, b1, w2_rand, b2))
    assert out_a.shape == (60, OUT_F)
    assert jnp.allclose(out_a, reference(x_a, w2_rand), atol=1e-4), "mismatch (N=60)"

    # Module-faithful params (w2 = 0) on the same input.
    out_a0 = jax.block_until_ready(
        spatial_transform_forward(x_a, w1, b1, w2, b2))
    assert jnp.allclose(out_a0, reference(x_a, w2), atol=1e-4), "mismatch (module init)"

    # (4, 8, 12, 12) -> N = 192 rows with tile_n=128: 2-step grid, ragged tail
    # (second block covers only 64 of 128 lanes; stores are masked by Pallas).
    x_b = jax.random.normal(k_x2, (4, 8, 12, 12), dtype=jnp.float32)
    out_b = jax.block_until_ready(
        spatial_transform_forward(x_b, w1, b1, w2_rand, b2, tile_n=128))
    assert out_b.shape == (192, OUT_F)
    assert jnp.allclose(out_b, reference(x_b, w2_rand), atol=1e-4), "mismatch (ragged tail)"

    # Optional bf16 x-stream (halves the HBM read); looser tolerance since x is
    # rounded to bf16 before the f32 accumulation.
    out_c = jax.block_until_ready(
        spatial_transform_forward(x_a, w1, b1, w2_rand, b2, x_dtype=jnp.bfloat16))
    assert jnp.allclose(out_c, reference(x_a, w2_rand), atol=5e-2), "mismatch (bf16)"

    print("KERNEL_OK")
</pallas_src>

<mosaic_0001>
module attributes {stable_mosaic.version = 11 : i64} {
  func.func @fc_loc_kernel(%arg0: i32, %arg1: memref<24x128xf32, #tpu.memory_space<vmem>>, %arg2: memref<20x24xf32, #tpu.memory_space<vmem>>, %arg3: memref<20x1xf32, #tpu.memory_space<vmem>>, %arg4: memref<4x20xf32, #tpu.memory_space<vmem>>, %arg5: memref<4x1xf32, #tpu.memory_space<vmem>>, %arg6: memref<4x128xf32, #tpu.memory_space<vmem>>) attributes {dimension_semantics = [#tpu.dimension_semantics<parallel>], iteration_bounds = array<i64: 1>, scalar_prefetch = 0 : i64, scratch_operands = 0 : i64, tpu.core_type = #tpu.core_type<tc>, window_params = [{transform_indices = @transform_0, window_bounds = array<i64: 24, 128>}, {pipeline_mode = #tpu.pipeline_mode<synchronous>, transform_indices = @transform_1, window_bounds = array<i64: 20, 24>}, {pipeline_mode = #tpu.pipeline_mode<synchronous>, transform_indices = @transform_2, window_bounds = array<i64: 20, 1>}, {pipeline_mode = #tpu.pipeline_mode<synchronous>, transform_indices = @transform_3, window_bounds = array<i64: 4, 20>}, {pipeline_mode = #tpu.pipeline_mode<synchronous>, transform_indices = @transform_4, window_bounds = array<i64: 4, 1>}, {transform_indices = @transform_5, window_bounds = array<i64: 4, 128>}]} {
    %c0 = arith.constant 0 : index
    %c0_0 = arith.constant 0 : index
    %0 = vector.load %arg1[%c0, %c0_0] : memref<24x128xf32, #tpu.memory_space<vmem>>, vector<24x128xf32>
    %c0_1 = arith.constant 0 : index
    %c0_2 = arith.constant 0 : index
    %1 = vector.load %arg2[%c0_1, %c0_2] : memref<20x24xf32, #tpu.memory_space<vmem>>, vector<20x24xf32>
    %cst = arith.constant dense<0.000000e+00> : vector<20x128xf32>
    %2 = tpu.matmul %1, %0, %cst {dimension_numbers = #tpu.dot_dimension_numbers<[1], [0], [0], [1], [0, 0, 1, 1], [], []>} : vector<20x24xf32>, vector<24x128xf32>, vector<20x128xf32> -> vector<20x128xf32>
    %c0_3 = arith.constant 0 : index
    %c0_4 = arith.constant 0 : index
    %3 = vector.load %arg3[%c0_3, %c0_4] : memref<20x1xf32, #tpu.memory_space<vmem>>, vector<20x1xf32>
    %4 = vector.broadcast %3 : vector<20x1xf32> to vector<20x128xf32>
    %5 = arith.addf %2, %4 : vector<20x128xf32>
    %cst_5 = arith.constant 0.000000e+00 : f32
    %6 = vector.broadcast %cst_5 : f32 to vector<20x128xf32>
    %7 = arith.maximumf %5, %6 : vector<20x128xf32>
    %c0_6 = arith.constant 0 : index
    %c0_7 = arith.constant 0 : index
    %8 = vector.load %arg4[%c0_6, %c0_7] : memref<4x20xf32, #tpu.memory_space<vmem>>, vector<4x20xf32>
    %cst_8 = arith.constant dense<0.000000e+00> : vector<4x128xf32>
    %9 = tpu.matmul %8, %7, %cst_8 {dimension_numbers = #tpu.dot_dimension_numbers<[1], [0], [0], [1], [0, 0, 1, 1], [], []>} : vector<4x20xf32>, vector<20x128xf32>, vector<4x128xf32> -> vector<4x128xf32>
    %c0_9 = arith.constant 0 : index
    %c0_10 = arith.constant 0 : index
    %10 = vector.load %arg5[%c0_9, %c0_10] : memref<4x1xf32, #tpu.memory_space<vmem>>, vector<4x1xf32>
    %11 = vector.broadcast %10 : vector<4x1xf32> to vector<4x128xf32>
    %12 = arith.addf %9, %11 : vector<4x128xf32>
    %c0_11 = arith.constant 0 : index
    %c0_12 = arith.constant 0 : index
    %13 = vector.load %arg6[%c0_11, %c0_12] : memref<4x128xf32, #tpu.memory_space<vmem>>, vector<4x128xf32>
    tpu.vector_store %arg6[%c0_11, %c0_12], %12 {strides = array<i32>} : memref<4x128xf32, #tpu.memory_space<vmem>>, vector<4x128xf32>,
    return
  }
  func.func @transform_0(%arg0: i32) -> (i32, i32) {
    %c0_i32 = arith.constant 0 : i32
    %c0_i32_0 = arith.constant 0 : i32
    return %c0_i32, %arg0 : i32, i32
  }
  func.func @transform_1(%arg0: i32) -> (i32, i32) {
    %c0_i32 = arith.constant 0 : i32
    %c0_i32_0 = arith.constant 0 : i32
    %c0_i32_1 = arith.constant 0 : i32
    return %c0_i32, %c0_i32_0 : i32, i32
  }
  func.func @transform_2(%arg0: i32) -> (i32, i32) {
    %c0_i32 = arith.constant 0 : i32
    %c0_i32_0 = arith.constant 0 : i32
    %c0_i32_1 = arith.constant 0 : i32
    return %c0_i32, %c0_i32_0 : i32, i32
  }
  func.func @transform_3(%arg0: i32) -> (i32, i32) {
    %c0_i32 = arith.constant 0 : i32
    %c0_i32_0 = arith.constant 0 : i32
    %c0_i32_1 = arith.constant 0 : i32
    return %c0_i32, %c0_i32_0 : i32, i32
  }
  func.func @transform_4(%arg0: i32) -> (i32, i32) {
    %c0_i32 = arith.constant 0 : i32
    %c0_i32_0 = arith.constant 0 : i32
    %c0_i32_1 = arith.constant 0 : i32
    return %c0_i32, %c0_i32_0 : i32, i32
  }
  func.func @transform_5(%arg0: i32) -> (i32, i32) {
    %c0_i32 = arith.constant 0 : i32
    %c0_i32_0 = arith.constant 0 : i32
    return %c0_i32, %arg0 : i32, i32
  }
}

</mosaic_0001>

<bundles_post_ra>
// kernel: tpu_custom_call.1
= control target key start
LH: loop header
LB: loop body
LE: loop exit
PB: predicated region body
PF: predicated region fallthrough
CT: control target
= control target key end

     0   :  { %10 = vsyncpa [#allocation3], 0  ;;  %s446_s0 = inlined_call_operand.vmem [shape: f32[24,60], index: 0, kind: input, shape index: {}]   ;;  %s447_s1 = inlined_call_operand.hbm [shape: f32[20,24], index: 1, kind: input, shape index: {}]   ;;  %s448_s2 = inlined_call_operand.vmem [shape: f32[20,1], index: 2, kind: input, shape index: {}]   ;;  %s449_s3 = inlined_call_operand.vmem [shape: f32[4,20], index: 3, kind: input, shape index: {}]   ;;  %s450_s4 = inlined_call_operand.vmem [shape: f32[4,1], index: 4, kind: input, shape index: {}]   ;;  %s451_s5 = inlined_call_operand.hbm [shape: f32[4,60], index: 5, kind: output, shape index: {}]  }
   0x1   :  { %11 = vsyncpa [#allocation4], 0  ;;  %s356_s18 = smov [#allocation2]   ;;  %s308_s22 = scalar_lea.hbm %s447_s1, 384 }
   0x2   :  { %s19_s19 = sshll.u32 %s356_s18, 4  ;;  %p309_p0 = scmp.ne.s32.totalorder %s447_s1, %s308_s22  ;;  %s20_s19 = int_to_ptr.vmem [resolvable:$true] %s19_s19 }
   0x3   :  { %p312_p1 = scmp.lt.u32.totalorder %s308_s22, %s447_s1 }
   0x5   :  { %p314_p2 = pnand %p312_p1, %p309_p0 }
   0x7   :  { %317 = shalt.err (!%p314_p2)
}
   0x8   :  { %s318_s27 = scalar_lea.vmem %s20_s19, 384  ;;  %p323_p4 = scmp.lt.s32.totalorder %s20_s19, %s20_s19 }
   0x9   :  { %p319_p3 = scmp.ne.s32.totalorder %s20_s19, %s318_s27  ;;  %p324_p5 = scmp.lt.s32.totalorder %s318_s27, %s318_s27 }
   0xb   :  { %p325_p6 = por %p324_p5, %p323_p4 }
   0xd   :  { %p326_p7 = pnand %p325_p6, %p319_p3 }
   0xf   :  { %329 = shalt.err (!%p326_p7)
}
  0x10   :  { %s357_s28 = smov 128   ;;  %s358_s29 = smov 8  }
  0x11   :  { %25 = dma.hbm_to_vmem [thread:$0]  %s447_s1, 384, %s20_s19, [#allocation3], %s357_s28, %s357_s28, %s358_s29  }
  0x12   :  { %352 = dma.done.wait [#allocation3], 384  }
  0x13   :  { %353 = vsyncadd [#allocation3], 4294966912  ;;  %v359_v0 = vmov 0.0|0.0   ;;  %vm360_vm0 = vmmov 0   ;;  %v361_v1 = vmov 0.0   ;;  %v362_v2 = vmov 0  }
  0x14   :  { %292 = vmatprep.subr.bf16.mxu0 %v359_v0  ;;  %274 = vmatprep.mubr.msk.f32.mxu0 %vm360_vm0, %v361_v1  ;;  %v35_v3 = vld [vmem:[%s446_s0] sm:$0xff]  ;;  %v36_v4 = vld [vmem:[%s446_s0 + $0x8] sm:$0xff]  ;;  %v43_v7 = vld [vmem:[%s448_s2 + $0x10] sm:$0xf]  ;;  %vm59_vm1 = vcmask 195584   ;;  %vm163_vm2 = vcmask 1043456  }
  0x15   :  { %306 = vset.pattern.permute.xlu0 %v362_v2  ;;  %307 = vset.pattern.permute.xlu1 %v362_v2  ;;  %v293_v5 = vpack.c.bf16 %v36_v4, %v35_v3  ;;  %v41_v6 = vld [vmem:[%s448_s2] sm:$0xff]  ;;  %v37_v8 = vld [vmem:[%s446_s0 + $0x10] sm:$0xff]  ;;  %v42_v9 = vld [vmem:[%s448_s2 + $0x8] sm:$0xff]  ;;  %vm159_vm3 = vcmask 162816  }
  0x16   :  { %295 = vmatprep.subr.bf16.mxu1 %v359_v0  ;;  %289 = vmatprep.mubr.msk.f32.mxu1 %vm360_vm0, %v361_v1  ;;  %v38_v10 = vld [vmem:[#allocation2] sm:$0xff]  ;;  %v39_v12 = vld [vmem:[#allocation2 + $0x8] sm:$0xff]  ;;  %v40_v13 = vld [vmem:[#allocation2 + $0x10] sm:$0xf] }
  0x17   :  { %294 = vmatpush3.bf16.msra.mxu0 %v293_v5  ;;  %46 = vperm.xlu0 %306, %v41_v6   ;;  %v153_v11 = vld [vmem:[%s450_s4] sm:$0xf]  ;;  %s363_s4 = smov [#allocation5]  }
  0x18   :  { %272 = vmatprep.subr.mxu0 %v361_v1  ;;  %56 = vperm.xlu1 %307, %v43_v7   ;;  %v152_v30 = vld [vmem:[%s449_s3] sm:$0xf]  ;;  %s244_s20 = sshll.u32 %s363_s4, 4  ;;  %s245_s20 = int_to_ptr.vmem [resolvable:$true] %s244_s20 }
  0x19   :  { %s330_s21 = scalar_lea.vmem %s245_s20, 64  ;;  %p335_p9 = scmp.lt.s32.totalorder %s245_s20, %s245_s20 }
  0x1a   :  { %p331_p8 = scmp.ne.s32.totalorder %s245_s20, %s330_s21  ;;  %p336_p10 = scmp.lt.s32.totalorder %s330_s21, %s330_s21 }
  0x1b   :  { %273 = vmatpush3.msra.mxu0 %v37_v8  ;;  %51 = vperm.xlu0 %306, %v42_v9  }
  0x1c   :  { %275 = vmatmul.mubr.msk.f32.vlgmr.msra.gmra.mrb[0].mxu0 %vm59_vm1, %v38_v10  ;;  %156 = vperm.xlu1 %307, %v153_v11   ;;  %p337_p11 = por %p336_p10, %p335_p9 }
  0x1d   :  { %277 = vmatprep.mubr.msk.f32.mxu0 %vm360_vm0, %v361_v1 }
  0x1e   :  { %p338_p12 = pnand %p337_p11, %p331_p8 }
  0x20   :  { %278 = vmatmul.mubr.msk.f32.gmra.mrb[2].mxu0 %vm59_vm1, %v39_v12 }
  0x21   :  { %280 = vmatprep.mubr.msk.f32.mxu0 %vm360_vm0, %v361_v1 }
  0x24   :  { %281 = vmatmul.mubr.msk.f32.gmra.mrb[4].mxu0 %vm59_vm1, %v40_v13 }
  0x96   :  { %v47_v14 = vpop.permute.xlu0 %46 }
  0x97   :  { %v57_v24 = vpop.permute.xlu1 %56 }
  0x9a   :  { %v52_v18 = vpop.permute.xlu0 %51 }
  0x9b   :  { %v157_v31 = vpop.permute.xlu1 %156 }
  0xef   :  { %v135_v15 = vpop.f32.mrb[0].mxu0 }
  0xf0   :  { %v276_v16 = vpop.f32.mrb[1].mxu0  ;;  %v136_v17 = vadd.f32 %v135_v15, %v47_v14 }
  0xf2   :  { %v149_v22 = vmax.f32 %v136_v17, 0.0 }
  0xf3   :  { %v140_v19 = vpop.f32.mrb[2].mxu0 }
  0xf4   :  { %v141_v20 = vadd.f32 %v140_v19, %v52_v18  ;;  %v279_v21 = vpop.f32.mrb[3].mxu0 }
  0xf6   :  { %v150_v23 = vmax.f32 %v141_v20, 0.0 }
  0xf7   :  { %v145_v25 = vpop.f32.mrb[4].mxu0 }
  0xf8   :  { %v146_v26 = vadd.f32 %v145_v25, %v57_v24  ;;  %v282_v27 = vpop.f32.mrb[5].mxu0  ;;  %v296_v28 = vpack.c.bf16 %v150_v23, %v149_v22 }
  0xfa   :  { %v151_v29 = vmax.f32 %v146_v26, 0.0  ;;  %297 = vmatpush3.bf16.msra.mxu1 %v296_v28 }
  0xfb   :  { %287 = vmatprep.subr.mxu1 %v361_v1 }
  0xfe   :  { %288 = vmatpush3.msk.msra.mxu1 %vm163_vm2, %v151_v29 }
  0xff   :  { %290 = vmatmul.mubr.msk.f32.vlgmr.msra.gmra.mrb[0].mxu1 %vm159_vm3, %v152_v30 }
 0x1d2   :  { %v233_v32 = vpop.f32.mrb[0].mxu1 }
 0x1d3   :  { %v234_v33 = vadd.f32 %v233_v32, %v157_v31  ;;  %v291_v34 = vpop.f32.mrb[1].mxu1 }
 0x1d5   :  { %237 = vst [vmem:[#allocation5] sm:$0xf] %v234_v33 }
 0x1d6   :  { %341 = shalt.err (!%p338_p12)
}
 0x1d7   :  { %s342_s23 = scalar_lea.hbm %s451_s5, 64 }
 0x1d8   :  { %p343_p13 = scmp.ne.s32.totalorder %s451_s5, %s342_s23  ;;  %p346_p0 = scmp.lt.u32.totalorder %s342_s23, %s451_s5 }
 0x1da   :  { %p348_p1 = pnand %p346_p0, %p343_p13 }
 0x1dc   :  { %351 = shalt.err (!%p348_p1)
}
 0x1dd   :  { %247 = dma.vmem_to_hbm [thread:$0]  %s245_s20, 64, %s451_s5, [#allocation4]  }
 0x1de   :  { %354 = dma.done.wait [#allocation4], 64  }
 0x1df   :  { %355 = vsyncadd [#allocation4], 4294967232 }
 0x1e0   :  { %251 = vsyncpa [#allocation3], 1 }
 0x1e1   :  { %252 = vsyncpa [#allocation4], 1 }

</bundles_post_ra>
